<compile_context>
chip_gen: v7x
topology: tpu7x:2x2x1
jax: 0.10.0
libtpu: 0.0.40
codegen_flags: <defaults>
</compile_context>

<pallas_src>
import math
import functools

import jax
import jax.numpy as jnp
from jax import lax
from jax.experimental import pallas as pl
from jax.experimental.pallas import tpu as pltpu

_MASK_VALUE = -0.7 * float(jnp.finfo(jnp.float32).max)   # finite: avoids exp(-inf - -inf) NaN


# --------------------------- small helpers ---------------------------

def _round_up(x, m):
    return -(-x // m) * m


def _tile(dim, target, align):
    """Pick (block, padded_dim).

    * dim <= target: full-dim block (always a legal BlockSpec), no padding.
    * otherwise: largest multiple of `align` <= target that divides dim;
      if none exists, pad dim up to a multiple of the align-rounded target.
    """
    if dim <= target:
        return dim, dim
    blk = (target // align) * align
    while blk >= align:
        if dim % blk == 0:
            return blk, dim
        blk -= align
    blk = max(align, (target // align) * align)
    return blk, _round_up(dim, blk)


@functools.lru_cache(maxsize=None)
def _vmem_limit_bytes():
    """Per-generation scoped-VMEM limit: ~70% of physical, capped at 64 MiB.

    v5e/v6e (128 MiB physical) -> 64 MiB; v7x (64 MiB physical) -> ~44 MiB.
    """
    try:
        phys = int(pltpu.get_tpu_info().vmem_capacity_bytes)
    except Exception:
        return 32 * 1024 * 1024
    return min(64 * 1024 * 1024, int(phys * 0.70))


# --------------------------- tiled linear: y = x @ W + b ---------------------------

def _linear_kernel(x_ref, w_ref, b_ref, o_ref, acc_ref, *, mxu_dtype):
    k = pl.program_id(2)

    @pl.when(k == 0)
    def _():
        acc_ref[...] = jnp.zeros_like(acc_ref)

    acc_ref[...] += jnp.dot(x_ref[...].astype(mxu_dtype),
                            w_ref[...].astype(mxu_dtype),
                            preferred_element_type=jnp.float32)

    @pl.when(k == pl.num_programs(2) - 1)
    def _():
        o_ref[...] = (acc_ref[...] + b_ref[...].astype(jnp.float32)).astype(o_ref.dtype)


def linear(x2d, w, b, *, out_dtype=None, tm=512, tn=512, tk=512,
           mxu_dtype=jnp.bfloat16):
    M, K = x2d.shape
    Kw, N = w.shape
    assert K == Kw and b.shape == (1, N)
    out_dtype = x2d.dtype if out_dtype is None else out_dtype

    bm, Mp = _tile(M, tm, 128)
    bn, Np = _tile(N, tn, 128)
    bk, Kp = _tile(K, tk, 128)

    if Mp != M or Kp != K:
        x2d = jnp.pad(x2d, ((0, Mp - M), (0, Kp - K)))
    if Kp != K or Np != N:
        w = jnp.pad(w, ((0, Kp - K), (0, Np - N)))
    if Np != N:
        b = jnp.pad(b, ((0, 0), (0, Np - N)))

    out = pl.pallas_call(
        functools.partial(_linear_kernel, mxu_dtype=mxu_dtype),
        out_shape=jax.ShapeDtypeStruct((Mp, Np), out_dtype),
        grid_spec=pltpu.PrefetchScalarGridSpec(
            num_scalar_prefetch=0,
            grid=(Mp // bm, Np // bn, Kp // bk),
            in_specs=[
                pl.BlockSpec((bm, bk), lambda i, j, k: (i, k)),
                pl.BlockSpec((bk, bn), lambda i, j, k: (k, j)),
                pl.BlockSpec((1, bn), lambda i, j, k: (0, j)),
            ],
            out_specs=pl.BlockSpec((bm, bn), lambda i, j, k: (i, j)),
            scratch_shapes=[pltpu.VMEM((bm, bn), jnp.float32)],
        ),
        compiler_params=pltpu.CompilerParams(
            dimension_semantics=("parallel", "parallel", "arbitrary"),
            vmem_limit_bytes=_vmem_limit_bytes()),
    )(x2d, w, b)

    if Mp != M or Np != N:
        out = out[:M, :N]
    return out


# --------------------------- flash attention core (compact causal grid) ---------------------------

def _flash_attn_kernel(qi_tbl_ref, ki_tbl_ref, q_ref, k_ref, v_ref, o_ref,
                       m_sc, l_sc, acc_sc, *, sm_scale, block_q, block_k, mxu_dtype):
    t = pl.program_id(2)
    qi = qi_tbl_ref[t]          # SMEM scalar reads (scalar-prefetched tables)
    ki = ki_tbl_ref[t]

    @pl.when(ki == 0)           # first KV block of this q row -> reset statistics
    def _():
        m_sc[...] = jnp.full_like(m_sc, -jnp.inf)
        l_sc[...] = jnp.zeros_like(l_sc)
        acc_sc[...] = jnp.zeros_like(acc_sc)

    def _accumulate(apply_mask):
        # sm_scale folded into q: (block_q, D) multiply instead of (block_q, block_k).
        q = (q_ref[...] * sm_scale).astype(mxu_dtype)     # (TQ, D)
        kk = k_ref[...].astype(mxu_dtype)                 # (TK, D)
        v = v_ref[...].astype(mxu_dtype)                  # (TK, D)
        # q @ k^T: contract last dims directly — no explicit transpose.
        s = lax.dot_general(q, kk, (((1,), (1,)), ((), ())),
                            preferred_element_type=jnp.float32)
        if apply_mask:  # diagonal block only; equal block sizes -> purely local mask
            row = lax.broadcasted_iota(jnp.int32, (block_q, block_k), 0)
            col = lax.broadcasted_iota(jnp.int32, (block_q, block_k), 1)
            s = jnp.where(col <= row, s, _MASK_VALUE)
        # online softmax (f32 statistics)
        m_prev = m_sc[...]
        m_new = jnp.maximum(m_prev, jnp.max(s, axis=-1, keepdims=True))
        alpha = jnp.exp(m_prev - m_new)
        p = jnp.exp(s - m_new)
        l_sc[...] = alpha * l_sc[...] + jnp.sum(p, axis=-1, keepdims=True)
        acc_sc[...] = alpha * acc_sc[...] + jnp.dot(
            p.astype(mxu_dtype), v, preferred_element_type=jnp.float32)
        m_sc[...] = m_new

    @pl.when(ki < qi)           # fully-visible causal block: no mask work
    def _():
        _accumulate(apply_mask=False)

    @pl.when(ki == qi)          # diagonal block: mask, then finalize this q block
    def _():
        _accumulate(apply_mask=True)
        inv_l = pl.reciprocal(l_sc[...], approx=True)     # EUP slot, ~free
        o_ref[...] = (acc_sc[...] * inv_l).astype(o_ref.dtype)
    # ki > qi pairs are never enumerated (compact triangular grid).


def flash_attention(q, k, v, *, sm_scale, max_block_q=512, mxu_dtype=jnp.bfloat16):
    """q, k, v: (B, H, T, D) head-major. Returns (B, H, T_pad, D) in q.dtype."""
    B, H, T, D = q.shape
    align = min(128, max(8, max_block_q))
    block, Tp = _tile(T, max_block_q, align)
    if Tp != T:
        pad = ((0, 0), (0, 0), (0, Tp - T), (0, 0))
        q, k, v = jnp.pad(q, pad), jnp.pad(k, pad), jnp.pad(v, pad)
    nq = Tp // block

    # Compact lower-triangular enumeration: only ki <= qi block pairs are visited.
    pairs = [(qi, ki) for qi in range(nq) for ki in range(qi + 1)]
    qi_tbl = jnp.asarray([p[0] for p in pairs], dtype=jnp.int32)
    ki_tbl = jnp.asarray([p[1] for p in pairs], dtype=jnp.int32)
    n_tri = len(pairs)

    kernel = functools.partial(_flash_attn_kernel, sm_scale=sm_scale,
                               block_q=block, block_k=block, mxu_dtype=mxu_dtype)

    q_map = lambda b, h, t, qi_t, ki_t: (b, h, qi_t[t], 0)
    kv_map = lambda b, h, t, qi_t, ki_t: (b, h, ki_t[t], 0)

    return pl.pallas_call(
        kernel,
        out_shape=jax.ShapeDtypeStruct((B, H, Tp, D), q.dtype),
        grid_spec=pltpu.PrefetchScalarGridSpec(
            num_scalar_prefetch=2,
            grid=(B, H, n_tri),
            in_specs=[
                pl.BlockSpec((None, None, block, D), q_map),
                pl.BlockSpec((None, None, block, D), kv_map),
                pl.BlockSpec((None, None, block, D), kv_map),
            ],
            out_specs=pl.BlockSpec((None, None, block, D), q_map),
            scratch_shapes=[
                pltpu.VMEM((block, 1), jnp.float32),   # running max
                pltpu.VMEM((block, 1), jnp.float32),   # running sum
                pltpu.VMEM((block, D), jnp.float32),   # f32 output accumulator
            ],
        ),
        compiler_params=pltpu.CompilerParams(
            dimension_semantics=("parallel", "parallel", "arbitrary"),
            vmem_limit_bytes=_vmem_limit_bytes()),
    )(qi_tbl, ki_tbl, q, k, v)


# --------------------------- head-folding output projection ---------------------------

def _head_proj_kernel(y_ref, w_ref, b_ref, o_ref, acc_ref, *, mxu_dtype):
    h = pl.program_id(3)

    @pl.when(h == 0)
    def _():
        acc_ref[...] = jnp.zeros_like(acc_ref)

    acc_ref[...] += jnp.dot(y_ref[...].astype(mxu_dtype),
                            w_ref[...].astype(mxu_dtype),
                            preferred_element_type=jnp.float32)

    @pl.when(h == pl.num_programs(3) - 1)
    def _():
        o_ref[...] = (acc_ref[...] + b_ref[...].astype(jnp.float32)).astype(o_ref.dtype)


def head_projection(y, w_heads, b, *, out_dtype, mxu_dtype=jnp.bfloat16,
                    tt_target=512, tn_target=512):
    """out[b, t, :] = sum_h y[b, h, t, :] @ w_heads[h] + b.

    Reads the head-major attention output directly (reduction axis = head index),
    so no separate (B,H,T,D) -> (B,T,C) transpose pass over HBM is needed.
    """
    B, H, T, D = y.shape
    Hw, Dw, N = w_heads.shape
    assert Hw == H and Dw == D and b.shape == (1, N)

    tt, Tp = _tile(T, tt_target, 128)
    tn, Np = _tile(N, tn_target, 128)
    if Tp != T:
        y = jnp.pad(y, ((0, 0), (0, 0), (0, Tp - T), (0, 0)))
    if Np != N:
        w_heads = jnp.pad(w_heads, ((0, 0), (0, 0), (0, Np - N)))
        b = jnp.pad(b, ((0, 0), (0, Np - N)))

    out = pl.pallas_call(
        functools.partial(_head_proj_kernel, mxu_dtype=mxu_dtype),
        out_shape=jax.ShapeDtypeStruct((B, Tp, Np), out_dtype),
        grid_spec=pltpu.PrefetchScalarGridSpec(
            num_scalar_prefetch=0,
            grid=(B, Tp // tt, Np // tn, H),
            in_specs=[
                pl.BlockSpec((None, None, tt, D), lambda b_, i, j, h: (b_, h, i, 0)),
                pl.BlockSpec((None, D, tn), lambda b_, i, j, h: (h, 0, j)),
                pl.BlockSpec((1, tn), lambda b_, i, j, h: (0, j)),
            ],
            out_specs=pl.BlockSpec((None, tt, tn), lambda b_, i, j, h: (b_, i, j)),
            scratch_shapes=[pltpu.VMEM((tt, tn), jnp.float32)],
        ),
        compiler_params=pltpu.CompilerParams(
            dimension_semantics=("parallel", "parallel", "parallel", "arbitrary"),
            vmem_limit_bytes=_vmem_limit_bytes()),
    )(y, w_heads, b)

    if Tp != T or Np != N:
        out = out[:, :T, :N]
    return out


# --------------------------- full module forward ---------------------------

def causal_self_attention(x, params, n_head, *, mxu_dtype=jnp.bfloat16, max_block_q=512):
    """x: (B, T, C). params: (C, C) weights in (in, out) layout and (1, C) biases."""
    B, T, C = x.shape
    assert C % n_head == 0
    D = C // n_head
    x2d = x.reshape(B * T, C)

    # Fused QKV projection: x is streamed from HBM once; q/k/v emitted in bf16.
    wqkv = jnp.concatenate([params["wq"], params["wk"], params["wv"]], axis=1)  # (C, 3C)
    bqkv = jnp.concatenate([params["bq"], params["bk"], params["bv"]], axis=1)  # (1, 3C)
    qkv = linear(x2d, wqkv, bqkv, out_dtype=jnp.bfloat16, mxu_dtype=mxu_dtype)  # (B*T, 3C)

    def heads(t2d):  # (B*T, C) -> head-major (B, H, T, D); bf16 layout plumbing only
        return t2d.reshape(B, T, n_head, D).transpose(0, 2, 1, 3)

    q = heads(qkv[:, :C])
    k = heads(qkv[:, C:2 * C])
    v = heads(qkv[:, 2 * C:])

    y = flash_attention(q, k, v, sm_scale=1.0 / math.sqrt(D),
                        max_block_q=max_block_q, mxu_dtype=mxu_dtype)   # (B, H, T_pad, D) bf16

    # Output projection with reduction over heads (no separate transpose HBM pass).
    wp_heads = params["wp"].reshape(n_head, D, C)
    out = head_projection(y, wp_heads, params["bp"], out_dtype=x.dtype,
                          mxu_dtype=mxu_dtype)                          # (B, T_pad, C)
    if out.shape[1] != T:
        out = out[:, :T, :]   # drop padded query rows
    # TODO(synk): attn_drop / resid_drop are identity (eval mode).
    return out


# --------------------------- reference & test ---------------------------

def _reference(x, params, n_head):
    B, T, C = x.shape
    D = C // n_head
    q = x @ params["wq"] + params["bq"]
    k = x @ params["wk"] + params["bk"]
    v = x @ params["wv"] + params["bv"]
    q = q.reshape(B, T, n_head, D).transpose(0, 2, 1, 3)
    k = k.reshape(B, T, n_head, D).transpose(0, 2, 1, 3)
    v = v.reshape(B, T, n_head, D).transpose(0, 2, 1, 3)
    att = jnp.einsum("bhqd,bhkd->bhqk", q, k) / math.sqrt(D)
    mask = jnp.tril(jnp.ones((T, T), dtype=bool))
    att = jnp.where(mask[None, None], att, -jnp.inf)
    att = jax.nn.softmax(att, axis=-1)
    y = jnp.einsum("bhqk,bhkd->bhqd", att, v)
    y = y.transpose(0, 2, 1, 3).reshape(B, T, C)
    return y @ params["wp"] + params["bp"]


def _run_case(key, B, T, C, n_head, **kwargs):
    ks = jax.random.split(key, 9)
    bound = 1.0 / math.sqrt(C)

    def u(k, shape):
        return jax.random.uniform(k, shape, jnp.float32, -bound, bound)

    params = {
        "wq": u(ks[0], (C, C)), "wk": u(ks[1], (C, C)),
        "wv": u(ks[2], (C, C)), "wp": u(ks[3], (C, C)),
        "bq": u(ks[4], (1, C)), "bk": u(ks[5], (1, C)),
        "bv": u(ks[6], (1, C)), "bp": u(ks[7], (1, C)),
    }
    x = jax.random.normal(ks[8], (B, T, C), jnp.float32)

    fwd = jax.jit(functools.partial(causal_self_attention, n_head=n_head, **kwargs))
    out = jax.block_until_ready(fwd(x, params))

    ref = _reference(x, params, n_head)
    err = float(jnp.max(jnp.abs(out - ref)))
    assert out.shape == ref.shape, f"shape mismatch {out.shape} vs {ref.shape}"
    # bf16 MXU operands + bf16 q/k/v/y storage + approx reciprocal -> loosened tolerance
    assert jnp.allclose(out, ref, atol=3e-2, rtol=3e-2), \
        f"mismatch vs reference (max abs err {err})"


if __name__ == "__main__":
    key = jax.random.PRNGKey(0)
    k1, k2 = jax.random.split(key)
    # Case 1: small shapes, single attention block (default tiling path).
    _run_case(k1, B=2, T=8, C=32, n_head=4)
    # Case 2: multi-block compact causal grid + T padding path (T=20, block_q=8).
    _run_case(k2, B=2, T=20, C=32, n_head=4, max_block_q=8)
    print("KERNEL_OK")
</pallas_src>

<mosaic_0001>
module attributes {stable_mosaic.version = 11 : i64} {
  func.func @_linear_kernel(%arg0: i32, %arg1: i32, %arg2: i32, %arg3: memref<16x32xf32, #tpu.memory_space<vmem>>, %arg4: memref<32x96xf32, #tpu.memory_space<vmem>>, %arg5: memref<1x96xf32, #tpu.memory_space<vmem>>, %arg6: memref<16x96xbf16, #tpu.memory_space<vmem>>, %arg7: memref<16x96xf32, #tpu.memory_space<vmem>>) attributes {dimension_semantics = [#tpu.dimension_semantics<parallel>, #tpu.dimension_semantics<parallel>, #tpu.dimension_semantics<arbitrary>], iteration_bounds = array<i64: 1, 1, 1>, scalar_prefetch = 0 : i64, scratch_operands = 1 : i64, tpu.core_type = #tpu.core_type<tc>, window_params = [{transform_indices = @transform_0, window_bounds = array<i64: 16, 32>}, {transform_indices = @transform_1, window_bounds = array<i64: 32, 96>}, {transform_indices = @transform_2, window_bounds = array<i64: 1, 96>}, {transform_indices = @transform_3, window_bounds = array<i64: 16, 96>}]} {
    %c0_i32 = arith.constant 0 : i32
    %0 = arith.cmpi eq, %arg2, %c0_i32 : i32
    %1 = arith.extui %0 : i1 to i32
    %c0_i32_0 = arith.constant 0 : i32
    %2 = arith.cmpi ne, %1, %c0_i32_0 : i32
    scf.if %2 {
      %cst_10 = arith.constant 0.000000e+00 : f32
      %14 = vector.broadcast %cst_10 : f32 to vector<16x96xf32>
      %c0_11 = arith.constant 0 : index
      %c0_12 = arith.constant 0 : index
      %15 = vector.load %arg7[%c0_11, %c0_12] : memref<16x96xf32, #tpu.memory_space<vmem>>, vector<16x96xf32>
      tpu.vector_store %arg7[%c0_11, %c0_12], %14 {strides = array<i32>} : memref<16x96xf32, #tpu.memory_space<vmem>>, vector<16x96xf32>,
    } else {
    }
    %c0 = arith.constant 0 : index
    %c0_1 = arith.constant 0 : index
    %3 = vector.load %arg7[%c0, %c0_1] : memref<16x96xf32, #tpu.memory_space<vmem>>, vector<16x96xf32>
    %c0_2 = arith.constant 0 : index
    %c0_3 = arith.constant 0 : index
    %4 = vector.load %arg3[%c0_2, %c0_3] : memref<16x32xf32, #tpu.memory_space<vmem>>, vector<16x32xf32>
    %5 = arith.truncf %4 : vector<16x32xf32> to vector<16x32xbf16>
    %c0_4 = arith.constant 0 : index
    %c0_5 = arith.constant 0 : index
    %6 = vector.load %arg4[%c0_4, %c0_5] : memref<32x96xf32, #tpu.memory_space<vmem>>, vector<32x96xf32>
    %7 = arith.truncf %6 : vector<32x96xf32> to vector<32x96xbf16>
    %cst = arith.constant dense<0.000000e+00> : vector<16x96xf32>
    %8 = tpu.matmul %5, %7, %cst {dimension_numbers = #tpu.dot_dimension_numbers<[1], [0], [0], [1], [0, 0, 1, 1], [], []>} : vector<16x32xbf16>, vector<32x96xbf16>, vector<16x96xf32> -> vector<16x96xf32>
    %9 = arith.addf %3, %8 : vector<16x96xf32>
    %c0_6 = arith.constant 0 : index
    %c0_7 = arith.constant 0 : index
    %10 = vector.load %arg7[%c0_6, %c0_7] : memref<16x96xf32, #tpu.memory_space<vmem>>, vector<16x96xf32>
    tpu.vector_store %arg7[%c0_6, %c0_7], %9 {strides = array<i32>} : memref<16x96xf32, #tpu.memory_space<vmem>>, vector<16x96xf32>,
    %c0_i32_8 = arith.constant 0 : i32
    %11 = arith.cmpi eq, %arg2, %c0_i32_8 : i32
    %12 = arith.extui %11 : i1 to i32
    %c0_i32_9 = arith.constant 0 : i32
    %13 = arith.cmpi ne, %12, %c0_i32_9 : i32
    scf.if %13 {
      %c0_10 = arith.constant 0 : index
      %c0_11 = arith.constant 0 : index
      %14 = vector.load %arg7[%c0_10, %c0_11] : memref<16x96xf32, #tpu.memory_space<vmem>>, vector<16x96xf32>
      %c0_12 = arith.constant 0 : index
      %c0_13 = arith.constant 0 : index
      %15 = vector.load %arg5[%c0_12, %c0_13] : memref<1x96xf32, #tpu.memory_space<vmem>>, vector<1x96xf32>
      %16 = vector.broadcast %15 : vector<1x96xf32> to vector<16x96xf32>
      %17 = arith.addf %14, %16 : vector<16x96xf32>
      %18 = arith.truncf %17 : vector<16x96xf32> to vector<16x96xbf16>
      %c0_14 = arith.constant 0 : index
      %c0_15 = arith.constant 0 : index
      %19 = vector.load %arg6[%c0_14, %c0_15] : memref<16x96xbf16, #tpu.memory_space<vmem>>, vector<16x96xbf16>
      tpu.vector_store %arg6[%c0_14, %c0_15], %18 {strides = array<i32>} : memref<16x96xbf16, #tpu.memory_space<vmem>>, vector<16x96xbf16>,
    } else {
    }
    return
  }
  func.func @transform_0(%arg0: i32, %arg1: i32, %arg2: i32) -> (i32, i32) {
    %c0_i32 = arith.constant 0 : i32
    return %arg0, %arg2 : i32, i32
  }
  func.func @transform_1(%arg0: i32, %arg1: i32, %arg2: i32) -> (i32, i32) {
    %c0_i32 = arith.constant 0 : i32
    return %arg2, %arg1 : i32, i32
  }
  func.func @transform_2(%arg0: i32, %arg1: i32, %arg2: i32) -> (i32, i32) {
    %c0_i32 = arith.constant 0 : i32
    %c0_i32_0 = arith.constant 0 : i32
    return %c0_i32, %arg1 : i32, i32
  }
  func.func @transform_3(%arg0: i32, %arg1: i32, %arg2: i32) -> (i32, i32) {
    %c0_i32 = arith.constant 0 : i32
    return %arg0, %arg1 : i32, i32
  }
}

module attributes {stable_mosaic.version = 11 : i64} {
  func.func @_head_proj_kernel(%arg0: i32, %arg1: i32, %arg2: i32, %arg3: i32, %arg4: memref<1x1x8x8xbf16, #tpu.memory_space<vmem>>, %arg5: memref<1x8x32xf32, #tpu.memory_space<vmem>>, %arg6: memref<1x32xf32, #tpu.memory_space<vmem>>, %arg7: memref<1x8x32xf32, #tpu.memory_space<vmem>>, %arg8: memref<8x32xf32, #tpu.memory_space<vmem>>) attributes {dimension_semantics = [#tpu.dimension_semantics<parallel>, #tpu.dimension_semantics<parallel>, #tpu.dimension_semantics<parallel>, #tpu.dimension_semantics<arbitrary>], iteration_bounds = array<i64: 2, 1, 1, 4>, scalar_prefetch = 0 : i64, scratch_operands = 1 : i64, tpu.core_type = #tpu.core_type<tc>, window_params = [{transform_indices = @transform_0, window_bounds = array<i64: 1, 1, 8, 8>}, {transform_indices = @transform_1, window_bounds = array<i64: 1, 8, 32>}, {transform_indices = @transform_2, window_bounds = array<i64: 1, 32>}, {transform_indices = @transform_3, window_bounds = array<i64: 1, 8, 32>}]} {
    %c0_i32 = arith.constant 0 : i32
    %0 = arith.cmpi eq, %arg3, %c0_i32 : i32
    %1 = arith.extui %0 : i1 to i32
    %c0_i32_0 = arith.constant 0 : i32
    %2 = arith.cmpi ne, %1, %c0_i32_0 : i32
    scf.if %2 {
      %cst_12 = arith.constant 0.000000e+00 : f32
      %15 = vector.broadcast %cst_12 : f32 to vector<8x32xf32>
      %c0_13 = arith.constant 0 : index
      %c0_14 = arith.constant 0 : index
      %16 = vector.load %arg8[%c0_13, %c0_14] : memref<8x32xf32, #tpu.memory_space<vmem>>, vector<8x32xf32>
      tpu.vector_store %arg8[%c0_13, %c0_14], %15 {strides = array<i32>} : memref<8x32xf32, #tpu.memory_space<vmem>>, vector<8x32xf32>,
    } else {
    }
    %c0 = arith.constant 0 : index
    %c0_1 = arith.constant 0 : index
    %3 = vector.load %arg8[%c0, %c0_1] : memref<8x32xf32, #tpu.memory_space<vmem>>, vector<8x32xf32>
    %c0_2 = arith.constant 0 : index
    %c0_3 = arith.constant 0 : index
    %c0_4 = arith.constant 0 : index
    %c0_5 = arith.constant 0 : index
    %4 = vector.load %arg4[%c0_2, %c0_3, %c0_4, %c0_5] : memref<1x1x8x8xbf16, #tpu.memory_space<vmem>>, vector<1x1x8x8xbf16>
    %5 = vector.shape_cast %4 : vector<1x1x8x8xbf16> to vector<8x8xbf16>
    %c0_6 = arith.constant 0 : index
    %c0_7 = arith.constant 0 : index
    %c0_8 = arith.constant 0 : index
    %6 = vector.load %arg5[%c0_6, %c0_7, %c0_8] : memref<1x8x32xf32, #tpu.memory_space<vmem>>, vector<1x8x32xf32>
    %7 = vector.shape_cast %6 : vector<1x8x32xf32> to vector<8x32xf32>
    %8 = arith.truncf %7 : vector<8x32xf32> to vector<8x32xbf16>
    %cst = arith.constant dense<0.000000e+00> : vector<8x32xf32>
    %9 = tpu.matmul %5, %8, %cst {dimension_numbers = #tpu.dot_dimension_numbers<[1], [0], [0], [1], [0, 0, 1, 1], [], []>} : vector<8x8xbf16>, vector<8x32xbf16>, vector<8x32xf32> -> vector<8x32xf32>
    %10 = arith.addf %3, %9 : vector<8x32xf32>
    %c0_9 = arith.constant 0 : index
    %c0_10 = arith.constant 0 : index
    %11 = vector.load %arg8[%c0_9, %c0_10] : memref<8x32xf32, #tpu.memory_space<vmem>>, vector<8x32xf32>
    tpu.vector_store %arg8[%c0_9, %c0_10], %10 {strides = array<i32>} : memref<8x32xf32, #tpu.memory_space<vmem>>, vector<8x32xf32>,
    %c3_i32 = arith.constant 3 : i32
    %12 = arith.cmpi eq, %arg3, %c3_i32 : i32
    %13 = arith.extui %12 : i1 to i32
    %c0_i32_11 = arith.constant 0 : i32
    %14 = arith.cmpi ne, %13, %c0_i32_11 : i32
    scf.if %14 {
      %c0_12 = arith.constant 0 : index
      %c0_13 = arith.constant 0 : index
      %15 = vector.load %arg8[%c0_12, %c0_13] : memref<8x32xf32, #tpu.memory_space<vmem>>, vector<8x32xf32>
      %c0_14 = arith.constant 0 : index
      %c0_15 = arith.constant 0 : index
      %16 = vector.load %arg6[%c0_14, %c0_15] : memref<1x32xf32, #tpu.memory_space<vmem>>, vector<1x32xf32>
      %17 = vector.broadcast %16 : vector<1x32xf32> to vector<8x32xf32>
      %18 = arith.addf %15, %17 : vector<8x32xf32>
      %c0_16 = arith.constant 0 : index
      %c0_17 = arith.constant 0 : index
      %c0_18 = arith.constant 0 : index
      %19 = vector.load %arg7[%c0_16, %c0_17, %c0_18] : memref<1x8x32xf32, #tpu.memory_space<vmem>>, vector<1x8x32xf32>
      %20 = vector.shape_cast %19 : vector<1x8x32xf32> to vector<8x32xf32>
      %21 = vector.shape_cast %18 : vector<8x32xf32> to vector<1x8x32xf32>
      tpu.vector_store %arg7[%c0_16, %c0_17, %c0_18], %21 {strides = array<i32>} : memref<1x8x32xf32, #tpu.memory_space<vmem>>, vector<1x8x32xf32>,
    } else {
    }
    return
  }
  func.func @transform_0(%arg0: i32, %arg1: i32, %arg2: i32, %arg3: i32) -> (i32, i32, i32, i32) {
    %c0_i32 = arith.constant 0 : i32
    %c0_i32_0 = arith.constant 0 : i32
    return %arg0, %arg3, %arg1, %c0_i32 : i32, i32, i32, i32
  }
  func.func @transform_1(%arg0: i32, %arg1: i32, %arg2: i32, %arg3: i32) -> (i32, i32, i32) {
    %c0_i32 = arith.constant 0 : i32
    %c0_i32_0 = arith.constant 0 : i32
    return %arg3, %c0_i32, %arg2 : i32, i32, i32
  }
  func.func @transform_2(%arg0: i32, %arg1: i32, %arg2: i32, %arg3: i32) -> (i32, i32) {
    %c0_i32 = arith.constant 0 : i32
    %c0_i32_0 = arith.constant 0 : i32
    return %c0_i32, %arg2 : i32, i32
  }
  func.func @transform_3(%arg0: i32, %arg1: i32, %arg2: i32, %arg3: i32) -> (i32, i32, i32) {
    %c0_i32 = arith.constant 0 : i32
    return %arg0, %arg1, %arg2 : i32, i32, i32
  }
}

module attributes {stable_mosaic.version = 11 : i64} {
  func.func @_flash_attn_kernel(%arg0: i32, %arg1: i32, %arg2: i32, %arg3: memref<1xi32, #tpu.memory_space<smem>>, %arg4: memref<1xi32, #tpu.memory_space<smem>>, %arg5: memref<1x1x8x8xbf16, #tpu.memory_space<vmem>>, %arg6: memref<1x1x8x8xbf16, #tpu.memory_space<vmem>>, %arg7: memref<1x1x8x8xbf16, #tpu.memory_space<vmem>>, %arg8: memref<1x1x8x8xbf16, #tpu.memory_space<vmem>>, %arg9: memref<8x1xf32, #tpu.memory_space<vmem>>, %arg10: memref<8x1xf32, #tpu.memory_space<vmem>>, %arg11: memref<8x8xf32, #tpu.memory_space<vmem>>) attributes {dimension_semantics = [#tpu.dimension_semantics<parallel>, #tpu.dimension_semantics<parallel>, #tpu.dimension_semantics<arbitrary>], iteration_bounds = array<i64: 2, 4, 1>, scalar_prefetch = 2 : i64, scratch_operands = 3 : i64, tpu.core_type = #tpu.core_type<tc>, window_params = [{transform_indices = @transform_0, window_bounds = array<i64: 1, 1, 8, 8>}, {transform_indices = @transform_1, window_bounds = array<i64: 1, 1, 8, 8>}, {transform_indices = @transform_2, window_bounds = array<i64: 1, 1, 8, 8>}, {transform_indices = @transform_3, window_bounds = array<i64: 1, 1, 8, 8>}]} {
    %0 = arith.index_cast %arg2 : i32 to index
    %1 = memref.load %arg3[%0] : memref<1xi32, #tpu.memory_space<smem>>
    %2 = arith.index_cast %arg2 : i32 to index
    %3 = memref.load %arg4[%2] : memref<1xi32, #tpu.memory_space<smem>>
    %c0_i32 = arith.constant 0 : i32
    %4 = arith.cmpi eq, %3, %c0_i32 : i32
    %5 = arith.extui %4 : i1 to i32
    %c0_i32_0 = arith.constant 0 : i32
    %6 = arith.cmpi ne, %5, %c0_i32_0 : i32
    scf.if %6 {
      %cst = arith.constant 0xFF800000 : f32
      %13 = vector.broadcast %cst : f32 to vector<8x1xf32>
      %c0 = arith.constant 0 : index
      %c0_3 = arith.constant 0 : index
      %14 = vector.load %arg9[%c0, %c0_3] : memref<8x1xf32, #tpu.memory_space<vmem>>, vector<8x1xf32>
      tpu.vector_store %arg9[%c0, %c0_3], %13 {strides = array<i32>} : memref<8x1xf32, #tpu.memory_space<vmem>>, vector<8x1xf32>,
      %cst_4 = arith.constant 0.000000e+00 : f32
      %15 = vector.broadcast %cst_4 : f32 to vector<8x1xf32>
      %c0_5 = arith.constant 0 : index
      %c0_6 = arith.constant 0 : index
      %16 = vector.load %arg10[%c0_5, %c0_6] : memref<8x1xf32, #tpu.memory_space<vmem>>, vector<8x1xf32>
      tpu.vector_store %arg10[%c0_5, %c0_6], %15 {strides = array<i32>} : memref<8x1xf32, #tpu.memory_space<vmem>>, vector<8x1xf32>,
      %cst_7 = arith.constant 0.000000e+00 : f32
      %17 = vector.broadcast %cst_7 : f32 to vector<8x8xf32>
      %c0_8 = arith.constant 0 : index
      %c0_9 = arith.constant 0 : index
      %18 = vector.load %arg11[%c0_8, %c0_9] : memref<8x8xf32, #tpu.memory_space<vmem>>, vector<8x8xf32>
      tpu.vector_store %arg11[%c0_8, %c0_9], %17 {strides = array<i32>} : memref<8x8xf32, #tpu.memory_space<vmem>>, vector<8x8xf32>,
    } else {
    }
    %7 = arith.cmpi slt, %3, %1 : i32
    %8 = arith.extui %7 : i1 to i32
    %c0_i32_1 = arith.constant 0 : i32
    %9 = arith.cmpi ne, %8, %c0_i32_1 : i32
    scf.if %9 {
      %c0 = arith.constant 0 : index
      %c0_3 = arith.constant 0 : index
      %c0_4 = arith.constant 0 : index
      %c0_5 = arith.constant 0 : index
      %13 = vector.load %arg5[%c0, %c0_3, %c0_4, %c0_5] : memref<1x1x8x8xbf16, #tpu.memory_space<vmem>>, vector<1x1x8x8xbf16>
      %14 = vector.shape_cast %13 : vector<1x1x8x8xbf16> to vector<8x8xbf16>
      %cst = arith.constant 3.535160e-01 : bf16
      %15 = vector.broadcast %cst : bf16 to vector<8x8xbf16>
      %16 = arith.mulf %14, %15 : vector<8x8xbf16>
      %c0_6 = arith.constant 0 : index
      %c0_7 = arith.constant 0 : index
      %c0_8 = arith.constant 0 : index
      %c0_9 = arith.constant 0 : index
      %17 = vector.load %arg6[%c0_6, %c0_7, %c0_8, %c0_9] : memref<1x1x8x8xbf16, #tpu.memory_space<vmem>>, vector<1x1x8x8xbf16>
      %18 = vector.shape_cast %17 : vector<1x1x8x8xbf16> to vector<8x8xbf16>
      %c0_10 = arith.constant 0 : index
      %c0_11 = arith.constant 0 : index
      %c0_12 = arith.constant 0 : index
      %c0_13 = arith.constant 0 : index
      %19 = vector.load %arg7[%c0_10, %c0_11, %c0_12, %c0_13] : memref<1x1x8x8xbf16, #tpu.memory_space<vmem>>, vector<1x1x8x8xbf16>
      %20 = vector.shape_cast %19 : vector<1x1x8x8xbf16> to vector<8x8xbf16>
      %cst_14 = arith.constant dense<0.000000e+00> : vector<8x8xf32>
      %21 = tpu.matmul %16, %18, %cst_14 {dimension_numbers = #tpu.dot_dimension_numbers<[1], [1], [0], [0], [0, 0, 1, 0], [], []>} : vector<8x8xbf16>, vector<8x8xbf16>, vector<8x8xf32> -> vector<8x8xf32>
      %c0_15 = arith.constant 0 : index
      %c0_16 = arith.constant 0 : index
      %22 = vector.load %arg9[%c0_15, %c0_16] : memref<8x1xf32, #tpu.memory_space<vmem>>, vector<8x1xf32>
      %cst_17 = arith.constant dense<0xFF800000> : vector<8xf32>
      %23 = vector.multi_reduction <maximumf>, %21, %cst_17 [1] : vector<8x8xf32> to vector<8xf32>
      %24 = vector.shape_cast %23 : vector<8xf32> to vector<8x1xf32>
      %25 = arith.maximumf %22, %24 : vector<8x1xf32>
      %26 = arith.subf %22, %25 : vector<8x1xf32>
      %27 = math.exp %26 : vector<8x1xf32>
      %28 = vector.broadcast %25 : vector<8x1xf32> to vector<8x8xf32>
      %29 = arith.subf %21, %28 : vector<8x8xf32>
      %30 = math.exp %29 : vector<8x8xf32>
      %c0_18 = arith.constant 0 : index
      %c0_19 = arith.constant 0 : index
      %31 = vector.load %arg10[%c0_18, %c0_19] : memref<8x1xf32, #tpu.memory_space<vmem>>, vector<8x1xf32>
      %32 = arith.mulf %27, %31 : vector<8x1xf32>
      %cst_20 = arith.constant dense<0.000000e+00> : vector<8xf32>
      %33 = vector.multi_reduction <add>, %30, %cst_20 [1] : vector<8x8xf32> to vector<8xf32>
      %34 = vector.shape_cast %33 : vector<8xf32> to vector<8x1xf32>
      %35 = arith.addf %32, %34 : vector<8x1xf32>
      %c0_21 = arith.constant 0 : index
      %c0_22 = arith.constant 0 : index
      %36 = vector.load %arg10[%c0_21, %c0_22] : memref<8x1xf32, #tpu.memory_space<vmem>>, vector<8x1xf32>
      tpu.vector_store %arg10[%c0_21, %c0_22], %35 {strides = array<i32>} : memref<8x1xf32, #tpu.memory_space<vmem>>, vector<8x1xf32>,
      %c0_23 = arith.constant 0 : index
      %c0_24 = arith.constant 0 : index
      %37 = vector.load %arg11[%c0_23, %c0_24] : memref<8x8xf32, #tpu.memory_space<vmem>>, vector<8x8xf32>
      %38 = vector.broadcast %27 : vector<8x1xf32> to vector<8x8xf32>
      %39 = arith.mulf %38, %37 : vector<8x8xf32>
      %40 = arith.truncf %30 : vector<8x8xf32> to vector<8x8xbf16>
      %cst_25 = arith.constant dense<0.000000e+00> : vector<8x8xf32>
      %41 = tpu.matmul %40, %20, %cst_25 {dimension_numbers = #tpu.dot_dimension_numbers<[1], [0], [0], [1], [0, 0, 1, 1], [], []>} : vector<8x8xbf16>, vector<8x8xbf16>, vector<8x8xf32> -> vector<8x8xf32>
      %42 = arith.addf %39, %41 : vector<8x8xf32>
      %c0_26 = arith.constant 0 : index
      %c0_27 = arith.constant 0 : index
      %43 = vector.load %arg11[%c0_26, %c0_27] : memref<8x8xf32, #tpu.memory_space<vmem>>, vector<8x8xf32>
      tpu.vector_store %arg11[%c0_26, %c0_27], %42 {strides = array<i32>} : memref<8x8xf32, #tpu.memory_space<vmem>>, vector<8x8xf32>,
      %c0_28 = arith.constant 0 : index
      %c0_29 = arith.constant 0 : index
      %44 = vector.load %arg9[%c0_28, %c0_29] : memref<8x1xf32, #tpu.memory_space<vmem>>, vector<8x1xf32>
      tpu.vector_store %arg9[%c0_28, %c0_29], %25 {strides = array<i32>} : memref<8x1xf32, #tpu.memory_space<vmem>>, vector<8x1xf32>,
    } else {
    }
    %10 = arith.cmpi eq, %3, %1 : i32
    %11 = arith.extui %10 : i1 to i32
    %c0_i32_2 = arith.constant 0 : i32
    %12 = arith.cmpi ne, %11, %c0_i32_2 : i32
    scf.if %12 {
      %c0 = arith.constant 0 : index
      %c0_3 = arith.constant 0 : index
      %c0_4 = arith.constant 0 : index
      %c0_5 = arith.constant 0 : index
      %13 = vector.load %arg5[%c0, %c0_3, %c0_4, %c0_5] : memref<1x1x8x8xbf16, #tpu.memory_space<vmem>>, vector<1x1x8x8xbf16>
      %14 = vector.shape_cast %13 : vector<1x1x8x8xbf16> to vector<8x8xbf16>
      %cst = arith.constant 3.535160e-01 : bf16
      %15 = vector.broadcast %cst : bf16 to vector<8x8xbf16>
      %16 = arith.mulf %14, %15 : vector<8x8xbf16>
      %c0_6 = arith.constant 0 : index
      %c0_7 = arith.constant 0 : index
      %c0_8 = arith.constant 0 : index
      %c0_9 = arith.constant 0 : index
      %17 = vector.load %arg6[%c0_6, %c0_7, %c0_8, %c0_9] : memref<1x1x8x8xbf16, #tpu.memory_space<vmem>>, vector<1x1x8x8xbf16>
      %18 = vector.shape_cast %17 : vector<1x1x8x8xbf16> to vector<8x8xbf16>
      %c0_10 = arith.constant 0 : index
      %c0_11 = arith.constant 0 : index
      %c0_12 = arith.constant 0 : index
      %c0_13 = arith.constant 0 : index
      %19 = vector.load %arg7[%c0_10, %c0_11, %c0_12, %c0_13] : memref<1x1x8x8xbf16, #tpu.memory_space<vmem>>, vector<1x1x8x8xbf16>
      %20 = vector.shape_cast %19 : vector<1x1x8x8xbf16> to vector<8x8xbf16>
      %cst_14 = arith.constant dense<0.000000e+00> : vector<8x8xf32>
      %21 = tpu.matmul %16, %18, %cst_14 {dimension_numbers = #tpu.dot_dimension_numbers<[1], [1], [0], [0], [0, 0, 1, 0], [], []>} : vector<8x8xbf16>, vector<8x8xbf16>, vector<8x8xf32> -> vector<8x8xf32>
      %22 = tpu.iota {dimensions = array<i32: 0>} : vector<8x8xi32>
      %23 = tpu.iota {dimensions = array<i32: 1>} : vector<8x8xi32>
      %24 = arith.cmpi sle, %23, %22 : vector<8x8xi32>
      %cst_15 = arith.constant -2.38197633E+38 : f32
      %25 = vector.broadcast %cst_15 : f32 to vector<8x8xf32>
      %26 = arith.select %24, %21, %25 : vector<8x8xi1>, vector<8x8xf32>
      %c0_16 = arith.constant 0 : index
      %c0_17 = arith.constant 0 : index
      %27 = vector.load %arg9[%c0_16, %c0_17] : memref<8x1xf32, #tpu.memory_space<vmem>>, vector<8x1xf32>
      %cst_18 = arith.constant dense<0xFF800000> : vector<8xf32>
      %28 = vector.multi_reduction <maximumf>, %26, %cst_18 [1] : vector<8x8xf32> to vector<8xf32>
      %29 = vector.shape_cast %28 : vector<8xf32> to vector<8x1xf32>
      %30 = arith.maximumf %27, %29 : vector<8x1xf32>
      %31 = arith.subf %27, %30 : vector<8x1xf32>
      %32 = math.exp %31 : vector<8x1xf32>
      %33 = vector.broadcast %30 : vector<8x1xf32> to vector<8x8xf32>
      %34 = arith.subf %26, %33 : vector<8x8xf32>
      %35 = math.exp %34 : vector<8x8xf32>
      %c0_19 = arith.constant 0 : index
      %c0_20 = arith.constant 0 : index
      %36 = vector.load %arg10[%c0_19, %c0_20] : memref<8x1xf32, #tpu.memory_space<vmem>>, vector<8x1xf32>
      %37 = arith.mulf %32, %36 : vector<8x1xf32>
      %cst_21 = arith.constant dense<0.000000e+00> : vector<8xf32>
      %38 = vector.multi_reduction <add>, %35, %cst_21 [1] : vector<8x8xf32> to vector<8xf32>
      %39 = vector.shape_cast %38 : vector<8xf32> to vector<8x1xf32>
      %40 = arith.addf %37, %39 : vector<8x1xf32>
      %c0_22 = arith.constant 0 : index
      %c0_23 = arith.constant 0 : index
      %41 = vector.load %arg10[%c0_22, %c0_23] : memref<8x1xf32, #tpu.memory_space<vmem>>, vector<8x1xf32>
      tpu.vector_store %arg10[%c0_22, %c0_23], %40 {strides = array<i32>} : memref<8x1xf32, #tpu.memory_space<vmem>>, vector<8x1xf32>,
      %c0_24 = arith.constant 0 : index
      %c0_25 = arith.constant 0 : index
      %42 = vector.load %arg11[%c0_24, %c0_25] : memref<8x8xf32, #tpu.memory_space<vmem>>, vector<8x8xf32>
      %43 = vector.broadcast %32 : vector<8x1xf32> to vector<8x8xf32>
      %44 = arith.mulf %43, %42 : vector<8x8xf32>
      %45 = arith.truncf %35 : vector<8x8xf32> to vector<8x8xbf16>
      %cst_26 = arith.constant dense<0.000000e+00> : vector<8x8xf32>
      %46 = tpu.matmul %45, %20, %cst_26 {dimension_numbers = #tpu.dot_dimension_numbers<[1], [0], [0], [1], [0, 0, 1, 1], [], []>} : vector<8x8xbf16>, vector<8x8xbf16>, vector<8x8xf32> -> vector<8x8xf32>
      %47 = arith.addf %44, %46 : vector<8x8xf32>
      %c0_27 = arith.constant 0 : index
      %c0_28 = arith.constant 0 : index
      %48 = vector.load %arg11[%c0_27, %c0_28] : memref<8x8xf32, #tpu.memory_space<vmem>>, vector<8x8xf32>
      tpu.vector_store %arg11[%c0_27, %c0_28], %47 {strides = array<i32>} : memref<8x8xf32, #tpu.memory_space<vmem>>, vector<8x8xf32>,
      %c0_29 = arith.constant 0 : index
      %c0_30 = arith.constant 0 : index
      %49 = vector.load %arg9[%c0_29, %c0_30] : memref<8x1xf32, #tpu.memory_space<vmem>>, vector<8x1xf32>
      tpu.vector_store %arg9[%c0_29, %c0_30], %30 {strides = array<i32>} : memref<8x1xf32, #tpu.memory_space<vmem>>, vector<8x1xf32>,
      %c0_31 = arith.constant 0 : index
      %c0_32 = arith.constant 0 : index
      %50 = vector.load %arg10[%c0_31, %c0_32] : memref<8x1xf32, #tpu.memory_space<vmem>>, vector<8x1xf32>
      %51 = tpu.reciprocal %50 {approx = true} : vector<8x1xf32> -> vector<8x1xf32>
      %c0_33 = arith.constant 0 : index
      %c0_34 = arith.constant 0 : index
      %52 = vector.load %arg11[%c0_33, %c0_34] : memref<8x8xf32, #tpu.memory_space<vmem>>, vector<8x8xf32>
      %53 = vector.broadcast %51 : vector<8x1xf32> to vector<8x8xf32>
      %54 = arith.mulf %52, %53 : vector<8x8xf32>
      %55 = arith.truncf %54 : vector<8x8xf32> to vector<8x8xbf16>
      %c0_35 = arith.constant 0 : index
      %c0_36 = arith.constant 0 : index
      %c0_37 = arith.constant 0 : index
      %c0_38 = arith.constant 0 : index
      %56 = vector.load %arg8[%c0_35, %c0_36, %c0_37, %c0_38] : memref<1x1x8x8xbf16, #tpu.memory_space<vmem>>, vector<1x1x8x8xbf16>
      %57 = vector.shape_cast %56 : vector<1x1x8x8xbf16> to vector<8x8xbf16>
      %58 = vector.shape_cast %55 : vector<8x8xbf16> to vector<1x1x8x8xbf16>
      tpu.vector_store %arg8[%c0_35, %c0_36, %c0_37, %c0_38], %58 {strides = array<i32>} : memref<1x1x8x8xbf16, #tpu.memory_space<vmem>>, vector<1x1x8x8xbf16>,
    } else {
    }
    return
  }
  func.func @transform_0(%arg0: i32, %arg1: i32, %arg2: i32, %arg3: memref<1xi32, #tpu.memory_space<smem>>, %arg4: memref<1xi32, #tpu.memory_space<smem>>) -> (i32, i32, i32, i32) {
    %0 = arith.index_cast %arg2 : i32 to index
    %1 = memref.load %arg3[%0] : memref<1xi32, #tpu.memory_space<smem>>
    %c0_i32 = arith.constant 0 : i32
    %c0_i32_0 = arith.constant 0 : i32
    return %arg0, %arg1, %1, %c0_i32 : i32, i32, i32, i32
  }
  func.func @transform_1(%arg0: i32, %arg1: i32, %arg2: i32, %arg3: memref<1xi32, #tpu.memory_space<smem>>, %arg4: memref<1xi32, #tpu.memory_space<smem>>) -> (i32, i32, i32, i32) {
    %0 = arith.index_cast %arg2 : i32 to index
    %1 = memref.load %arg4[%0] : memref<1xi32, #tpu.memory_space<smem>>
    %c0_i32 = arith.constant 0 : i32
    %c0_i32_0 = arith.constant 0 : i32
    return %arg0, %arg1, %1, %c0_i32 : i32, i32, i32, i32
  }
  func.func @transform_2(%arg0: i32, %arg1: i32, %arg2: i32, %arg3: memref<1xi32, #tpu.memory_space<smem>>, %arg4: memref<1xi32, #tpu.memory_space<smem>>) -> (i32, i32, i32, i32) {
    %0 = arith.index_cast %arg2 : i32 to index
    %1 = memref.load %arg4[%0] : memref<1xi32, #tpu.memory_space<smem>>
    %c0_i32 = arith.constant 0 : i32
    %c0_i32_0 = arith.constant 0 : i32
    return %arg0, %arg1, %1, %c0_i32 : i32, i32, i32, i32
  }
  func.func @transform_3(%arg0: i32, %arg1: i32, %arg2: i32, %arg3: memref<1xi32, #tpu.memory_space<smem>>, %arg4: memref<1xi32, #tpu.memory_space<smem>>) -> (i32, i32, i32, i32) {
    %0 = arith.index_cast %arg2 : i32 to index
    %1 = memref.load %arg3[%0] : memref<1xi32, #tpu.memory_space<smem>>
    %c0_i32 = arith.constant 0 : i32
    %c0_i32_0 = arith.constant 0 : i32
    return %arg0, %arg1, %1, %c0_i32 : i32, i32, i32, i32
  }
}

</mosaic_0001>

<bundles_post_ra>
// kernel: causal_self_attention.3
= control target key start
LH: loop header
LB: loop body
LE: loop exit
PB: predicated region body
PF: predicated region fallthrough
CT: control target
= control target key end

     0   :  { %vm19_vm0 = vcmask 785408   ;;  %v131_v0 = vmov 0.0   ;;  %vm132_vm1 = vmmov 0   ;;  %vm33_vm2 = vcmask 261120   ;;  %s184_s1 = inlined_call_operand.vmem [shape: f32[32,96], index: 1, kind: input, shape index: {}]   ;;  %s185_s0 = inlined_call_operand.vmem [shape: f32[16,32], index: 0, kind: input, shape index: {}]   ;;  %s186_s2 = inlined_call_operand.vmem [shape: f32[1,96], index: 2, kind: input, shape index: {}]   ;;  %s187_s3 = inlined_call_operand.vmem [shape: bf16[16,96], index: 3, kind: output, shape index: {}]  }
   0x1   :  { %121 = vmatprep.subr.bf16.mxu0 %v131_v0  ;;  %v27_v1 = vld [vmem:[%s184_s1] sm:$0xff]  ;;  %v28_v2 = vld [vmem:[%s184_s1 + $0x8] sm:$0xff]  ;;  %v29_v3 = vld [vmem:[%s184_s1 + $0x10] sm:$0xff]  ;;  %125 = vmatprep.mubr.msk.bf16.mxu0 %vm132_vm1, %v131_v0  ;;  %20 = vst.msk [vmem:[#allocation2] sm:$0xff] %vm19_vm0, %v131_v0  ;;  %vm105_vm3 = vcmask 781312  }
   0x2   :  { %21 = vst.msk [vmem:[#allocation2 + $0x8] sm:$0xff] %vm19_vm0, %v131_v0  ;;  %v31_v4 = vpack.c.bf16 %v28_v2, %v27_v1  ;;  %v30_v5 = vld [vmem:[%s184_s1 + $0x18] sm:$0xff]  ;;  %v24_v7 = vld [vmem:[%s185_s0] sm:$0xff]  ;;  %v25_v8 = vld [vmem:[%s185_s0 + $0x8] sm:$0xff] }
   0x3   :  { %v32_v6 = vpack.c.bf16 %v30_v5, %v29_v3  ;;  %v26_v9 = vpack.c.bf16 %v25_v8, %v24_v7  ;;  %v113_v18 = vld [vmem:[%s186_s2] ss:$0 sm:$0xff] }
   0x4   :  { %122 = vmatpush3.bf16.msra.mxu0 %v31_v4 }
   0x5   :  { %123 = vmatprep.subr.bf16.mxu0 %v131_v0 }
   0x8   :  { %124 = vmatpush3.bf16.msra.mxu0 %v32_v6  ;;  %v22_v10 = vld [vmem:[#allocation2] sm:$0xff] }
   0x9   :  { %v23_v12 = vld [vmem:[#allocation2 + $0x8] sm:$0xff] }
   0xb   :  { %126 = vmatmul.mubr.msk.bf16.vlgmr.msra.gmra.mrb[0].mxu0 %vm33_vm2, %v26_v9 }
  0xde   :  { %v71_v11 = vpop.f32.mrb[0].mxu0 }
  0xdf   :  { %v78_v13 = vadd.f32 %v71_v11, %v22_v10  ;;  %v127_v14 = vpop.f32.mrb[1].mxu0 }
  0xe0   :  { %v74_v15 = vpop.f32.mrb[2].mxu0 }
  0xe1   :  { %81 = vst.msk [vmem:[#allocation2] sm:$0xff] %vm19_vm0, %v78_v13  ;;  %v79_v16 = vadd.f32 %v74_v15, %v23_v12  ;;  %v128_v17 = vpop.f32.mrb[3].mxu0 }
  0xe3   :  { %82 = vst.msk [vmem:[#allocation2 + $0x8] sm:$0xff] %vm19_vm0, %v79_v16 }
  0xe8   :  { %v86_v19 = vld [vmem:[#allocation2] sm:$0xff] }
  0xe9   :  { %v95_v20 = vadd.f32 %v113_v18, %v86_v19 }
  0xea   :  { %v87_v21 = vld [vmem:[#allocation2 + $0x8] sm:$0xff] }
  0xeb   :  { %v116_v22 = vpack.c.bf16 %v95_v20, %v95_v20  ;;  %v96_v23 = vadd.f32 %v113_v18, %v87_v21 }
  0xed   :  { %106 = vst.msk [vmem:[%s187_s3] sm:$0xf] %vm105_vm3, %v116_v22  ;;  %v117_v24 = vpack.c.bf16 %v96_v23, %v96_v23 }
  0xef   :  { %107 = vst.msk [vmem:[%s187_s3 + $0x4] sm:$0xf] %vm105_vm3, %v117_v24 }

// kernel: causal_self_attention.5
= control target key start
LH: loop header
LB: loop body
LE: loop exit
PB: predicated region body
PF: predicated region fallthrough
CT: control target
= control target key end

     0   :  { %8 = vsyncpa [#allocation4], 0  ;;  %s836_s0 = inlined_call_operand.vmem [shape: bf16[2,4,8,8], index: 0, kind: input, shape index: {}]   ;;  %s837_s1 = inlined_call_operand.vmem [shape: f32[4,8,32], index: 1, kind: input, shape index: {}]   ;;  %s838_s2 = inlined_call_operand.vmem [shape: f32[1,32], index: 2, kind: input, shape index: {}]   ;;  %s839_s3 = inlined_call_operand.hbm [shape: f32[2,8,32], index: 3, kind: output, shape index: {}]  }
   0x1   :  { %10 = vsyncpa [#allocation4 + $0x1], 0  ;;  %s689_s12 = smov 0   ;;  %s691_s13 = smov 0  }
   0x2   :  { %s693_s14 = smov 0   ;;  %s695_s15 = smov 0  }
   0x3   :  { %s697_s16 = smov 0   ;;  %s699_s17 = smov 0  }
   0x4   :  { %s701_s18 = smov 0   ;;  %s703_s19 = smov 0  }
   0x5 LB: > { %s469_s20 = sadd.s32 4294967295, %s663_s19   ;;  %s470_s21 = sadd.s32 4294967294, %s663_s19   ;;  %s663_s19 = sphi %s703_s19, %s16_s19   ;;  %s659_s18 = sphi %s701_s18, %s851_s18   ;;  %s655_s17 = sphi %s699_s17, %s850_s17   ;;  %s651_s16 = sphi %s697_s16, %s849_s16   ;;  %s647_s15 = sphi %s695_s15, %s848_s15   ;;  %s643_s14 = sphi %s693_s14, %s847_s14   ;;  %s639_s13 = sphi %s691_s13, %s846_s13   ;;  %s635_s12 = sphi %s689_s12, %s845_s12  }
   0x6   : > { %s31_s22 = sadd.s32 1, %s655_s17  ;;  %s42_s23 = sadd.s32 1, %s659_s18 }
   0x7   : > { %p32_p0 = scmp.ge.s32.totalorder %s31_s22, 4  ;;  %p147_p1 = scmp.ne.s32.totalorder %s643_s14, %s639_s13 }
   0x8   : > { %p148_p2 = scmp.eq.s32.totalorder %s469_s20, 7  ;;  %p153_p4 = scmp.ne.s32.totalorder %s639_s13, %s635_s12 }
   0x9   : > { %s853_s22 = smov (%p32_p0, %s31_s22), 0  ;;  %s855_s23 = smov (!%p32_p0, %s42_s23), %s659_s18 }
   0xa   : > { %p738_p3 = por %p148_p2, %p147_p1  ;;  %p44_p5 = scmp.ge.s32.totalorder %s855_s23, 2 }
   0xb   : > { %p154_p6 = scmp.eq.s32.totalorder %s470_s21, 7  ;;  %p474_p7 = scmp.ge.s32.totalorder %s663_s19, 1 }
   0xc   : > { %p202_p8 = scmp.lt.s32.totalorder %s663_s19, 9  ;;  %s857_s23 = smov (%p44_p5, %s855_s23), 0 }
   0xd   : > { %842 = sst [smem:[#allocation6_spill]] %s857_s23  ;;  %p748_p9 = por %p154_p6, %p153_p4 }
   0xe   : > { %p203_p10 = pnand %p474_p7, %p202_p8  ;;  %s130_s26 = ssub.s32 %s659_s18, %s857_s23 }
   0xf   : > { %s137_s27 = sadd.s32 1, %s643_s14  ;;  %p135_p11 = scmp.eq.s32.totalorder %s130_s26, 0 }
  0x10   : > { %206 = sbr.rel (%p203_p10) target bundleno = 288 (0x120), region = 32  ;;  %s239_s29 = sand.u32 (!%p203_p10), 1, %s639_s13  }
  0x11   : > { %s756_s28 = scalar_select %p135_p11, %s643_s14, %s137_s27  }
  0x12   : > { %p242_p12 = scmp.lt.s32.totalorder (!%p203_p10), %s651_s16, 1  ;;  %s762_s30 = sshll.u32 (!%p203_p10), %s239_s29, 3 }
  0x13   : > { %p244_p13 = scmp.lt.s32.totalorder (!%p203_p10), %s647_s15, 3  ;;  %s241_s23 = scalar_lea.vmem (!%p203_p10), [#allocation3], %s762_s30 }
  0x14   : > { %p479_p0 = scmp.ne.s32.totalorder (!%p203_p10), %s647_s15, 0 }
  0x17   : > { %s243_s4 = scalar_select %p242_p12, %s651_s16, 1 }
  0x18   : > { %s245_s5 = scalar_select %p244_p13, %s647_s15, 3 }
  0x19   : > { %s476_s6 = sshll.u32 %s243_s4, 2  ;;  %267 = sbr.rel (%p479_p0) target bundleno = 32 (0x20), region = 36  ;;  %vm268_vm0 = vcmask (!%p479_p0), 261120   ;;  %v665_v0 = vmov (!%p479_p0), 0.0  }
  0x1a   : > { %s250_s7 = sadd.s32 %s476_s6, %s245_s5  ;;  %s478_s8 = sshll.u32 %s245_s5, 3  ;;  %269 = vst.msk [vmem:[#allocation2] sm:$0xff] (!%p479_p0), %vm268_vm0, %v665_v0 }
  0x1b   : > { %s477_s9 = sshll.u32 %s250_s7, 2  ;;  %s259_s20 = scalar_lea.vmem %s837_s1, %s478_s8 }
  0x1c   : > { %s252_s27 = scalar_lea.vmem %s836_s0, %s477_s9 }
  0x20 PF: > { %v272_v1 = vld [vmem:[%s259_s20] sm:$0xff]  ;;  %vm278_vm1 = vcmask 1043456   ;;  %v666_v2 = vmov 0.0   ;;  %vm667_vm2 = vmmov 0   ;;  %vm274_vm3 = vcmask 64512   ;;  %p481_p1 = scmp.ne.s32.totalorder %s647_s15, 3 }
  0x21   : > { %489 = vmatprep.subr.bf16.mxu0 %v666_v2  ;;  %v273_v3 = vpack.c.bf16 %v272_v1, %v272_v1  ;;  %491 = vmatprep.mubr.msk.bf16.mxu0 %vm667_vm2, %v666_v2  ;;  %v271_v5 = vld [vmem:[%s252_s27] sm:$0xf]  ;;  %vm323_vm4 = vcmask 261120  }
  0x22   : > { %v270_v6 = vld [vmem:[#allocation2] sm:$0xff] }
  0x23   : > { %v280_v4 = vsel %vm278_vm1, %v273_v3, 0  ;;  %v482_v13 = vld [vmem:[%s838_s2] ss:$0 sm:$0xff] (!%p481_p1) }
  0x24   : > { %490 = vmatpush3.bf16.msra.mxu0 %v280_v4 }
  0x27   : > { %492 = vmatmul.mubr.msk.bf16.vlgmr.msra.gmra.mrb[0].mxu0 %vm274_vm3, %v271_v5 }
  0xf7   : > { %328 = sbr.rel (%p481_p1) target bundleno = 264 (0x108), region = 40 }
  0xfa   : > { %v316_v7 = vpop.f32.mrb[0].mxu0 }
  0xfb   : > { %v322_v8 = vadd.f32 %v316_v7, %v270_v6  ;;  %v493_v9 = vpop.f32.mrb[1].mxu0 }
  0xfc   : > { %v319_v10 = vpop.f32.mrb[2].mxu0 }
  0xfd   : > { %324 = vst.msk [vmem:[#allocation2] sm:$0xff] %vm323_vm4, %v322_v8  ;;  %v494_v11 = vpop.f32.mrb[3].mxu0 }
 0x104   : > { %v329_v12 = vld [vmem:[#allocation2] sm:$0xff] }
 0x105   : > { %v337_v14 = vadd.f32 %v482_v13, %v329_v12 }
 0x107   : > { %338 = vst.msk [vmem:[%s241_s23] sm:$0xff] %vm323_vm4, %v337_v14 }
 0x108 PF: > { %s484_s6 = sshll.u32 %s651_s16, 7  ;;  %s355_s9 = sshll.u32 %s241_s23, 4  ;;  %s356_s9 = int_to_ptr.vmem [resolvable:$true] %s355_s9 }
 0x109   : > { %s785_s15 = scalar_lea.hbm %s839_s3, %s484_s6  ;;  %s340_s10 = scalar_lea.sflag [#allocation4], %s239_s29 }
 0x10a   : > { %s569_s11 = scalar_lea.vmem %s356_s9, 128  ;;  %s668_s20 = smov [#allocation3]  }
 0x10b   : > { %p570_p2 = scmp.ne.s32.totalorder %s356_s9, %s569_s11  ;;  %s573_s21 = sshll.u32 %s668_s20, 4  ;;  %s574_s21 = int_to_ptr.vmem [resolvable:$false] %s573_s21 }
 0x10c   : > { %s575_s26 = scalar_lea.vmem %s574_s21, 256  ;;  %p576_p6 = scmp.lt.s32.totalorder %s356_s9, %s574_s21 }
 0x10d   : > { %p571_p4 = pnand %p570_p2, %p738_p3  ;;  %p577_p7 = scmp.lt.s32.totalorder %s575_s26, %s569_s11 }
 0x10f   : > { %p572_p5 = pneg %p571_p4  ;;  %p578_p8 = por %p577_p7, %p576_p6 }
 0x111   : > { %p579_p10 = pnand %p578_p8, %p572_p5 }
 0x113   : > { %582 = shalt.err (!%p579_p10)
}
 0x114   : > { %s583_s16 = scalar_lea.hbm %s785_s15, 128  ;;  %s587_s30 = scalar_lea.hbm %s839_s3, 256 }
 0x115   : > { %p584_p11 = scmp.ne.s32.totalorder %s785_s15, %s583_s16  ;;  %p588_p0 = scmp.lt.u32.totalorder %s785_s15, %s839_s3 }
 0x116   : > { %p589_p1 = scmp.lt.u32.totalorder %s587_s30, %s583_s16  ;;  %p591_p4 = scmp.lt.u32.totalorder %s583_s16, %s785_s15 }
 0x117   : > { %p585_p12 = pnand %p584_p11, %p738_p3 }
 0x118   : > { %p590_p2 = por %p589_p1, %p588_p0 }
 0x119   : > { %p586_p13 = pneg %p585_p12 }
 0x11a   : > { %p592_p5 = por %p591_p4, %p590_p2 }
 0x11c   : > { %p593_p6 = pnand %p592_p5, %p586_p13 }
 0x11e   : > { %596 = shalt.err (!%p593_p6)
}
 0x11f   : > { %495 = dma.vmem_to_hbm [thread:$0]  (%p738_p3), %s356_s9, 128, %s785_s15, %s340_s10  }
 0x120 PF: > { %p501_p7 = scmp.ge.s32.totalorder %s663_s19, 2  ;;  %s367_s5 = sand.u32 1, %s635_s12  }
 0x121   : > { %s368_s6 = scalar_lea.sflag [#allocation4], %s367_s5 }
 0x122   : > { %p498_p8 = pnand %p501_p7, %p748_p9 }
 0x124   : > { %630 = dma.done.wait (!%p498_p8), %s368_s6, 128  }
 0x125   : > { %632 = vsyncadd (!%p498_p8), %s368_s6, 4294967168  ;;  %s16_s19 = sadd.s32 1, %s663_s19   ;;  %s844_s24 = sld [smem:[#allocation6_spill]] }
 0x126   : > { %p13_p10 = scmp.ge.s32.totalorder %s16_s19, 10   ;;  %s845_s12 = smov %s639_s13 }
 0x127   : > { %s846_s13 = smov %s643_s14  ;;  %s847_s14 = smov %s756_s28 }
 0x128   : > { %s848_s15 = smov %s655_s17  ;;  %s849_s16 = smov %s659_s18 }
 0x129   : > { %s850_s17 = smov %s853_s22  ;;  %15 = sbr.rel (!%p13_p10) target bundleno = 5 (0x5), region = 81 }
 0x12b   : > { %s851_s18 = smov %s844_s24 }
 0x130   :  { %373 = vsyncpa [#allocation4], 1 }
 0x131   :  { %375 = vsyncpa [#allocation4 + $0x1], 1 }

// kernel: causal_self_attention.4
= control target key start
LH: loop header
LB: loop body
LE: loop exit
PB: predicated region body
PF: predicated region fallthrough
CT: control target
= control target key end

     0   :  { %s995_s22 = smov 0   ;;  %s997_s23 = smov 0   ;;  %s1096_s0 = inlined_call_operand.<no memory space> [shape: s32[1], index: 0, kind: input, shape index: {}, may-alias: {0,1}]   ;;  %s1097_s1 = inlined_call_operand.<no memory space> [shape: s32[1], index: 1, kind: input, shape index: {}, may-alias: {0,1}]   ;;  %s1098_s2 = inlined_call_operand.vmem [shape: bf16[2,4,8,8], index: 2, kind: input, shape index: {}]   ;;  %s1099_s3 = inlined_call_operand.vmem [shape: bf16[2,4,8,8], index: 3, kind: input, shape index: {}]   ;;  %s1100_s4 = inlined_call_operand.vmem [shape: bf16[2,4,8,8], index: 4, kind: input, shape index: {}]   ;;  %s1101_s5 = inlined_call_operand.vmem [shape: bf16[2,4,8,8], index: 5, kind: output, shape index: {}]  }
   0x1   :  { %10 = sst [smem:[#allocation6]] %s1096_s0  ;;  %s999_s24 = smov 0  }
   0x2   :  { %11 = sst [smem:[#allocation7]] %s1097_s1  ;;  %s1001_s25 = smov 0  }
   0x3   :  { %s1003_s26 = smov 0  }
   0x4 LB: > { %s32_s0 = sadd.s32 1, %s941_s24  ;;  %s36_s1 = sadd.s32 1, %s945_s25  ;;  %s949_s26 = sphi %s1003_s26, %s17_s26   ;;  %s945_s25 = sphi %s1001_s25, %s1105_s25   ;;  %s941_s24 = sphi %s999_s24, %s1104_s24   ;;  %s937_s23 = sphi %s997_s23, %s1103_s23   ;;  %s933_s22 = sphi %s995_s22, %s1102_s22  }
   0x5   : > { %p34_p0 = scmp.ge.s32.totalorder %s32_s0, 4  ;;  %p799_p1 = scmp.ge.s32.totalorder %s949_s26, 1 }
   0x6   : > { %p228_p2 = scmp.lt.s32.totalorder %s949_s26, 9 }
   0x7   : > { %s1107_s0 = smov (%p34_p0, %s32_s0), 0  ;;  %s1109_s1 = smov (!%p34_p0, %s36_s1), %s945_s25 }
   0x8   : > { %p229_p3 = pnand %p799_p1, %p228_p2  ;;  %p38_p4 = scmp.ge.s32.totalorder %s1109_s1, 2 }
   0x9   : > { %s1025_s27 = sld [smem:[#allocation6]] (!%p229_p3)  ;;  %p291_p5 = scmp.lt.s32.totalorder (!%p229_p3), %s937_s23, 1 }
   0xa   : > { %s1111_s1 = smov (%p38_p4, %s1109_s1), 0  ;;  %232 = sbr.rel (%p229_p3) target bundleno = 1568 (0x620), region = 32 }
   0xb   : > { %p293_p6 = scmp.lt.s32.totalorder (!%p229_p3), %s933_s22, 3  ;;  %s1027_s28 = sld [smem:[#allocation7]] (!%p229_p3) }
   0xf   : > { %p295_p7 = scmp.lt.s32.totalorder (!%p229_p3), %s1025_s27, 0 }
  0x11   : > { %s1113_s23 = smov (!%p291_p5, %s937_s23), 1  ;;  %s1115_s22 = smov (!%p293_p6, %s933_s22), 3 }
  0x12   : > { %s800_s29 = sshll.u32 %s1113_s23, 2  ;;  %p308_p8 = scmp.lt.s32.totalorder %s1027_s28, 0 }
  0x13   : > { %s296_s30 = scalar_select %p295_p7, %s1025_s27, 0 }
  0x14   : > { %s309_s6 = scalar_select %p308_p8, %s1027_s28, 0 }
  0x15   : > { %s297_s7 = sadd.s32 %s296_s30, %s1115_s22  ;;  %p808_p9 = scmp.ne.s32.totalorder %s1027_s28, 0 }
  0x16   : > { %s299_s8 = sadd.s32 %s800_s29, %s297_s7  ;;  %s310_s9 = sadd.s32 %s309_s6, %s1115_s22  ;;  %vm350_vm0 = vcmask (!%p808_p9), 7168   ;;  %vm353_vm1 = vcmask (!%p808_p9), 64512   ;;  %v951_v0 = vmov (!%p808_p9), -inf   ;;  %v952_v1 = vmov (!%p808_p9), 0.0  }
  0x17   : > { %s801_s10 = sshll.u32 %s299_s8, 2  ;;  %s312_s11 = sadd.s32 %s800_s29, %s310_s9  ;;  %351 = vst.msk [vmem:[#allocation2] sm:$0xff] (!%p808_p9), %vm350_vm0, %v951_v0  ;;  %352 = vst.msk [vmem:[#allocation3] sm:$0xff] (!%p808_p9), %vm350_vm0, %v952_v1 }
  0x18   : > { %s1036_s14 = scalar_lea.vmem %s1098_s2, %s801_s10  ;;  %s803_s15 = sshll.u32 %s312_s11, 2  ;;  %354 = vst.msk [vmem:[#allocation4] sm:$0xff] (!%p808_p9), %vm353_vm1, %v952_v1 }
  0x19   : > { %s1041_s18 = scalar_lea.vmem %s1099_s3, %s803_s15  ;;  %s1046_s21 = scalar_lea.vmem %s1100_s4, %s803_s15 }
  0x1a   : > { %s1051_s29 = scalar_lea.vmem %s1101_s5, %s801_s10  ;;  %349 = sbr.rel (%p808_p9) target bundleno = 33 (0x21), region = 36 }
  0x21 PF: > { %p809_p10 = scmp.ge.s32.totalorder %s1027_s28, %s1025_s27 }
  0x22   : > { %v361_v2 = vld [vmem:[%s1041_s18] sm:$0xf] (!%p809_p10)  ;;  %vm363_vm2 = vcmask (!%p809_p10), 64512   ;;  %v953_v3 = vmov (!%p809_p10), 0.0   ;;  %vm954_vm3 = vmmov (!%p809_p10), 0   ;;  %v955_v12 = vmov (!%p809_p10), 0  }
  0x23   : > { %358 = sbr.rel (%p809_p10) target bundleno = 760 (0x2f8), region = 40  ;;  %825 = vmatprep.subr.bf16.mxu0 (!%p809_p10), %v953_v3  ;;  %v368_v4 = vsel (!%p809_p10), %vm363_vm2, %v361_v2, 0  ;;  %827 = vmatprep.mubr.msk.bf16.mxu0 (!%p809_p10), %vm954_vm3, %v953_v3  ;;  %v359_v5 = vld [vmem:[%s1036_s14] sm:$0xf] (!%p809_p10)  ;;  %vm432_vm4 = vcmask (!%p809_p10), 7168   ;;  %vm445_vm5 = vcmask (!%p809_p10), 1043456  }
  0x24   : > { %826 = vmatpush3.bf16.xpose.msra.mxu0 (!%p809_p10), %v368_v4  ;;  %831 = vmatprep.subr.bf16.mxu1 (!%p809_p10), %v953_v3  ;;  %v360_v6 = vmul.bf16 (!%p809_p10), 1052065461, %v359_v5  ;;  %v410_v13 = vld [vmem:[#allocation2] sm:$0xff] (!%p809_p10)  ;;  %v426_v27 = vld [vmem:[#allocation3] sm:$0xff] (!%p809_p10)  ;;  %v434_v31 = vld [vmem:[#allocation4] sm:$0xff] (!%p809_p10) }
  0x25   : > { %833 = vmatprep.mubr.msk.bf16.mxu1 (!%p809_p10), %vm954_vm3, %v953_v3  ;;  %897 = vset.pattern.permute.xlu0 (!%p809_p10), %v955_v12  ;;  %v362_v17 = vld [vmem:[%s1046_s21] sm:$0xf] (!%p809_p10) }
  0x26   : > { %898 = vset.pattern.permute.xlu1 (!%p809_p10), %v955_v12  ;;  %v447_v18 = vsel (!%p809_p10), %vm445_vm5, %v362_v17, 0 }
  0x27   : > { %832 = vmatpush3.bf16.msra.mxu1 (!%p809_p10), %v447_v18 }
  0x2b   : > { %828 = vmatmul.mubr.msk.bf16.vlgmr.msra.gmra.mrb[0].mxu0 %vm363_vm2, %v360_v6 }
  0xfe   : > { %v404_v7 = vpop.f32.mrb[0].mxu0 }
  0xff   : > { %v829_v8 = vpop.f32.mrb[1].mxu0  ;;  %v411_v9 = vsel %vm363_vm2, %v404_v7, -inf }
 0x100   : > { %412 = vmax.xlane.f32.xlu0 %v411_v9  ;;  %v407_v10 = vpop.f32.mrb[2].mxu0 }
 0x101   : > { %v830_v11 = vpop.f32.mrb[3].mxu0 }
 0x18d   : > { %v413_v14 = vpop.xlane.xlu0 %412 }
 0x18e   : > { %v414_v15 = vmax.f32 %v410_v13, %v413_v14 }
 0x190   : > { %v415_v16 = vsub.f32 %v410_v13, %v414_v15  ;;  %491 = vst.msk [vmem:[#allocation2] sm:$0xff] %vm432_vm4, %v414_v15  ;;  %420 = vperm.xlu0 %897, %v414_v15  }
 0x192   : > { %v416_v25 = vmul.f32 1.442695, %v415_v16 }
 0x20f   : > { %v421_v19 = vpop.permute.xlu0 %420 }
 0x210   : > { %v423_v20 = vsub.f32 %v404_v7, %v421_v19 }
 0x212   : > { %v424_v21 = vmul.f32 1.442695, %v423_v20 }
 0x214   : > { %899 = vpow2.f32 %v424_v21 }
 0x215   : > { %901 = vpow2.f32 %v416_v25 }
 0x21e   : > { %v900_v22 = vpop.eup %899 }
 0x21f   : > { %v428_v23 = vsel %vm363_vm2, %v900_v22, 0.0  ;;  %v441_v24 = vpack.c.bf16 %v900_v22, %v900_v22  ;;  %v902_v26 = vpop.eup %901 }
 0x220   : > { %429 = vadd.xlane.f32.xlu1 %v428_v23  ;;  %v427_v28 = vmul.f32 %v902_v26, %v426_v27 }
 0x221   : > { %834 = vmatmul.mubr.msk.bf16.vlgmr.msra.gmra.mrb[0].mxu1 %vm363_vm2, %v441_v24 }
 0x231   : > { %437 = vperm.xlu1 %898, %v902_v26  }
 0x2ad   : > { %v430_v29 = vpop.xlane.xlu1 %429 }
 0x2ae   : > { %v431_v30 = vadd.f32 %v430_v29, %v427_v28 }
 0x2b0   : > { %433 = vst.msk [vmem:[#allocation3] sm:$0xff] %vm432_vm4, %v431_v30 }
 0x2b1   : > { %v438_v32 = vpop.permute.xlu1 %437 }
 0x2b2   : > { %v440_v33 = vmul.f32 %v438_v32, %v434_v31 }
 0x2f4   : > { %v483_v34 = vpop.f32.mrb[0].mxu1 }
 0x2f5   : > { %v489_v35 = vadd.f32 %v483_v34, %v440_v33  ;;  %v835_v36 = vpop.f32.mrb[1].mxu1 }
 0x2f6   : > { %v486_v37 = vpop.f32.mrb[2].mxu1 }
 0x2f7   : > { %490 = vst.msk [vmem:[#allocation4] sm:$0xff] %vm363_vm2, %v489_v35  ;;  %v836_v38 = vpop.f32.mrb[3].mxu1 }
 0x2f8 PF: > { %p812_p11 = scmp.ne.s32.totalorder %s1027_s28, %s1025_s27 }
 0x2f9   : > { %v498_v39 = vld [vmem:[%s1041_s18] sm:$0xf] (!%p812_p11)  ;;  %vm500_vm6 = vcmask (!%p812_p11), 64512   ;;  %v956_v40 = vmov (!%p812_p11), 0.0   ;;  %vm957_vm7 = vmmov (!%p812_p11), 0   ;;  %v547_v44 = vlaneseq (!%p812_p11)  ;;  %v569_v4 = vld [vmem:[#allocation3] sm:$0xff] (!%p812_p11) }
 0x2fa   : > { %495 = sbr.rel (%p812_p11) target bundleno = 1568 (0x620), region = 44  ;;  %837 = vmatprep.subr.bf16.mxu0 (!%p812_p11), %v956_v40  ;;  %v505_v41 = vsel (!%p812_p11), %vm500_vm6, %v498_v39, 0  ;;  %839 = vmatprep.mubr.msk.bf16.mxu0 (!%p812_p11), %vm957_vm7, %v956_v40  ;;  %v496_v42 = vld [vmem:[%s1036_s14] sm:$0xf] (!%p812_p11)  ;;  %v958_v53 = vmov (!%p812_p11), 0   ;;  %vm575_vm9 = vcmask (!%p812_p11), 7168  }
 0x2fb   : > { %838 = vmatpush3.bf16.xpose.msra.mxu0 (!%p812_p11), %v505_v41  ;;  %843 = vmatprep.subr.bf16.mxu1 (!%p812_p11), %v956_v40  ;;  %v497_v43 = vmul.bf16 (!%p812_p11), 1052065461, %v496_v42  ;;  %v548_v45 = vshrl.u32 (!%p812_p11), %v547_v44, 7  ;;  %v550_v46 = vand.u32 (!%p812_p11), 127, %v547_v44  ;;  %v553_v54 = vld [vmem:[#allocation2] sm:$0xff] (!%p812_p11)  ;;  %vm588_vm10 = vcmask (!%p812_p11), 1043456  }
 0x2fc   : > { %845 = vmatprep.mubr.msk.bf16.mxu1 (!%p812_p11), %vm957_vm7, %v956_v40  ;;  %903 = vset.pattern.permute.xlu0 (!%p812_p11), %v958_v53  ;;  %v499_v58 = vld [vmem:[%s1046_s21] sm:$0xf] (!%p812_p11)  ;;  %vm645_vm11 = vcmask (!%p812_p11), 60416  }
 0x2fd   : > { %vm551_vm8 = vcmp.le.s32.totalorder (!%p812_p11), %v550_v46, %v548_v45  ;;  %904 = vset.pattern.permute.xlu1 (!%p812_p11), %v958_v53  ;;  %v590_v59 = vsel (!%p812_p11), %vm588_vm10, %v499_v58, 0 }
 0x2fe   : > { %844 = vmatpush3.bf16.msra.mxu1 (!%p812_p11), %v590_v59  ;;  %v577_v10 = vld [vmem:[#allocation4] sm:$0xff] (!%p812_p11) }
 0x302   : > { %840 = vmatmul.mubr.msk.bf16.vlgmr.msra.gmra.mrb[0].mxu0 %vm500_vm6, %v497_v43 }
 0x3d5   : > { %v541_v47 = vpop.f32.mrb[0].mxu0 }
 0x3d6   : > { %v552_v48 = vsel %vm551_vm8, %v541_v47, -2.3819763e+38  ;;  %v841_v49 = vpop.f32.mrb[1].mxu0 }
 0x3d7   : > { %v544_v50 = vpop.f32.mrb[2].mxu0  ;;  %v554_v51 = vsel %vm500_vm6, %v552_v48, -inf }
 0x3d8   : > { %555 = vmax.xlane.f32.xlu0 %v554_v51  ;;  %v842_v52 = vpop.f32.mrb[3].mxu0 }
 0x465   : > { %v556_v55 = vpop.xlane.xlu0 %555 }
 0x466   : > { %v557_v56 = vmax.f32 %v553_v54, %v556_v55 }
 0x468   : > { %v558_v57 = vsub.f32 %v553_v54, %v557_v56  ;;  %634 = vst.msk [vmem:[#allocation2] sm:$0xff] %vm575_vm9, %v557_v56  ;;  %563 = vperm.xlu0 %903, %v557_v56  }
 0x46a   : > { %v559_v2 = vmul.f32 1.442695, %v558_v57 }
 0x4e7   : > { %v564_v60 = vpop.permute.xlu0 %563 }
 0x4e8   : > { %v566_v61 = vsub.f32 %v552_v48, %v564_v60 }
 0x4ea   : > { %v567_v62 = vmul.f32 1.442695, %v566_v61 }
 0x4ec   : > { %905 = vpow2.f32 %v567_v62 }
 0x4ed   : > { %907 = vpow2.f32 %v559_v2 }
 0x4f6   : > { %v906_v63 = vpop.eup %905 }
 0x4f7   : > { %v571_v0 = vsel %vm500_vm6, %v906_v63, 0.0  ;;  %v584_v1 = vpack.c.bf16 %v906_v63, %v906_v63  ;;  %v908_v3 = vpop.eup %907 }
 0x4f8   : > { %572 = vadd.xlane.f32.xlu1 %v571_v0  ;;  %v570_v5 = vmul.f32 %v908_v3, %v569_v4 }
 0x4f9   : > { %846 = vmatmul.mubr.msk.bf16.vlgmr.msra.gmra.mrb[0].mxu1 %vm500_vm6, %v584_v1 }
 0x509   : > { %580 = vperm.xlu1 %904, %v908_v3  }
 0x585   : > { %v573_v6 = vpop.xlane.xlu1 %572 }
 0x586   : > { %v574_v7 = vadd.f32 %v573_v6, %v570_v5 }
 0x588   : > { %576 = vst.msk [vmem:[#allocation3] sm:$0xff] %vm575_vm9, %v574_v7 }
 0x589   : > { %v581_v11 = vpop.permute.xlu1 %580 }
 0x58a   : > { %v583_v12 = vmul.f32 %v581_v11, %v577_v10 }
 0x58f   : > { %v635_v8 = vld [vmem:[#allocation3] sm:$0xff] }
 0x590   : > { %909 = vrcp.f32 %v635_v8 }
 0x59a   : > { %v910_v9 = vpop.eup %909 }
 0x59b   : > { %640 = vperm.xlu1 %904, %v910_v9  }
 0x5cc   : > { %v626_v13 = vpop.f32.mrb[0].mxu1 }
 0x5cd   : > { %v632_v14 = vadd.f32 %v626_v13, %v583_v12  ;;  %v847_v15 = vpop.f32.mrb[1].mxu1 }
 0x5ce   : > { %v629_v16 = vpop.f32.mrb[2].mxu1 }
 0x5cf   : > { %633 = vst.msk [vmem:[#allocation4] sm:$0xff] %vm500_vm6, %v632_v14  ;;  %v848_v17 = vpop.f32.mrb[3].mxu1 }
 0x5d6   : > { %v637_v18 = vld [vmem:[#allocation4] sm:$0xff] }
 0x61a   : > { %v641_v19 = vpop.permute.xlu1 %640 }
 0x61b   : > { %v643_v20 = vmul.f32 %v641_v19, %v637_v18 }
 0x61d   : > { %v644_v21 = vpack.c.bf16 %v643_v20, %v643_v20 }
 0x61f   : > { %646 = vst.msk [vmem:[%s1051_s29] sm:$0xf] %vm645_vm11, %v644_v21 }
 0x620 PF: > { %s17_s26 = sadd.s32 1, %s949_s26   ;;  %s1102_s22 = smov %s941_s24 }
 0x621   : > { %p14_p12 = scmp.ge.s32.totalorder %s17_s26, 10   ;;  %s1103_s23 = smov %s945_s25 }
 0x622   : > { %s1104_s24 = smov %s1107_s0  ;;  %s1105_s25 = smov %s1111_s1 }
 0x623   :  { %16 = sbr.rel (!%p14_p12) target bundleno = 4 (0x4), region = 80 }

</bundles_post_ra>
